<compile_context>
chip_gen: v7x
topology: tpu7x:2x2x1
jax: 0.10.0
libtpu: 0.0.40
codegen_flags: <defaults>
</compile_context>

<pallas_src>
import functools

import jax
import jax.numpy as jnp
import numpy as np
from jax import lax
from jax.experimental import pallas as pl
from jax.experimental.pallas import tpu as pltpu

_LANE = 128
_BN_EPS = 1e-5


def _round_up(x, m):
    return ((x + m - 1) // m) * m


# ---------------------------------------------------------------------------
# Capability / hardware probes (run once, outside any jit trace)
# ---------------------------------------------------------------------------
def _probe_single_buffer_support():
    """Check that pipeline_mode=pl.Buffered(1) is accepted by this Pallas/Mosaic build."""
    if not hasattr(pl, "Buffered"):
        return False
    try:
        def _k(x_ref, o_ref):
            o_ref[...] = x_ref[...] * 2.0

        y = pl.pallas_call(
            _k,
            out_shape=jax.ShapeDtypeStruct((8, 128), jnp.float32),
            grid=(1,),
            in_specs=[pl.BlockSpec((8, 128), lambda i: (0, 0),
                                   pipeline_mode=pl.Buffered(1))],
            out_specs=pl.BlockSpec((8, 128), lambda i: (0, 0)),
        )(jnp.zeros((8, 128), jnp.float32))
        jax.block_until_ready(y)
        return True
    except Exception:
        return False


_SINGLE_BUFFER_WEIGHTS = _probe_single_buffer_support()


def _vmem_limit_bytes():
    """Generation-aware VMEM budget: ~100 MiB on 128-MiB parts (v5e/v6e), ~51 MiB on v7x (64 MiB)."""
    try:
        cap = int(pltpu.get_tpu_info().vmem_capacity_bytes)
    except Exception:
        cap = 64 * 1024 * 1024
    return int(min(100 * 1024 * 1024, int(cap * 0.8)))


def _resident_spec(shape):
    """Constant-index (VMEM-resident) weight/bias spec; single-buffered when supported."""
    if _SINGLE_BUFFER_WEIGHTS:
        return pl.BlockSpec(shape, lambda i: (0, 0), pipeline_mode=pl.Buffered(1))
    return pl.BlockSpec(shape, lambda i: (0, 0))


def _choose_batch_tiling(B, block_b):
    """Batch tile so that (a) padding is O(8) rows, (b) grid has >=2 steps when B allows (v7x)."""
    n = max(1, pl.cdiv(B, block_b))
    if B >= 16 and n < 2:
        n = 2                                  # let the megacore "parallel" axis shard across TCs
    TB = _round_up(pl.cdiv(B, n), 8)
    n = pl.cdiv(B, TB)
    return TB, n * TB


# ---------------------------------------------------------------------------
# Pallas kernel: the entire MLP stack (embedding gather fused into layer 0)
# ---------------------------------------------------------------------------
def _mlp_fused_kernel(x_cat_ref, x_cont_ref, *refs, num_layers, num_cat, cat_offsets):
    # refs = (w_mh, w_cont, b0, w_1, b_1, ..., w_{L-1}, b_{L-1}, o_ref); last layer has no ReLU.
    o_ref = refs[-1]
    w_mh_ref, w_cont_ref, b0_ref = refs[0], refs[1], refs[2]
    rest = refs[3:-1]

    tb = x_cat_ref.shape[0]
    k_mh = w_mh_ref.shape[0]

    # ---- layer 0: embedding lookup as a multi-hot matmul (+ BN-folded continuous features) ----
    # multi_hot[b, cat_offsets[c] + x_cat[b, c]] = 1  (tables are disjoint blocks -> exact 0/1).
    col = lax.broadcasted_iota(jnp.int32, (tb, k_mh), 1)
    mh = col == (x_cat_ref[:, 0:1] + cat_offsets[0])
    for c in range(1, num_cat):
        mh = mh | (col == (x_cat_ref[:, c:c + 1] + cat_offsets[c]))
    h = jnp.dot(mh.astype(jnp.bfloat16), w_mh_ref[...],
                preferred_element_type=jnp.float32)                       # MXU, f32 acc
    h = h + jnp.dot(x_cont_ref[...].astype(jnp.bfloat16), w_cont_ref[...],
                    preferred_element_type=jnp.float32)                   # tiny-K MXU matmul
    h = h + b0_ref[...]
    h = jnp.maximum(h, 0.0).astype(jnp.bfloat16)     # fused ReLU + bf16 downcast (layer 0 hidden)

    # ---- hidden layers 1.. and output layer (eval-mode BN already folded into these weights) ----
    for l in range(1, num_layers):
        w_ref, b_ref = rest[2 * (l - 1)], rest[2 * (l - 1) + 1]
        h = jnp.dot(h, w_ref[...], preferred_element_type=jnp.float32) + b_ref[...]
        if l < num_layers - 1:
            h = jnp.maximum(h, 0.0).astype(jnp.bfloat16)
    o_ref[...] = h.astype(o_ref.dtype)               # bf16, lane-dense (128-wide) store


# ---------------------------------------------------------------------------
# Parameter construction (deterministic, synthetic, PyTorch-like "raw" params)
# ---------------------------------------------------------------------------
def _bn_params(key, num_features):
    k1, k2, k3, k4 = jax.random.split(key, 4)
    gamma = 1.0 + 0.1 * jax.random.normal(k1, (1, num_features), jnp.float32)
    beta = 0.1 * jax.random.normal(k2, (1, num_features), jnp.float32)
    running_mean = 0.1 * jax.random.normal(k3, (1, num_features), jnp.float32)
    running_var = jax.random.uniform(k4, (1, num_features), jnp.float32, 0.5, 1.5)
    scale = gamma / jnp.sqrt(running_var + _BN_EPS)
    shift = beta - running_mean * scale
    return scale, shift


def init_params(key, embedding_table_shapes, num_continuous, layer_hidden_dims, num_classes):
    keys = iter(jax.random.split(key, 64))
    params = {}
    params["embeddings"] = [
        0.05 * jax.random.normal(next(keys), (card, dim), jnp.float32)
        for (card, dim) in embedding_table_shapes.values()
    ]
    embedding_size = sum(dim for _, dim in embedding_table_shapes.values())
    params["cont_bn_scale"], params["cont_bn_shift"] = _bn_params(next(keys), num_continuous)

    layer_input_sizes = [embedding_size + num_continuous] + layer_hidden_dims[:-1]
    params["layers"] = []
    for in_f, out_f in zip(layer_input_sizes, layer_hidden_dims):
        bound = 1.0 / float(np.sqrt(in_f))
        w = jax.random.uniform(next(keys), (in_f, out_f), jnp.float32, -bound, bound)
        b = jax.random.uniform(next(keys), (1, out_f), jnp.float32, -bound, bound)
        bn_scale, bn_shift = _bn_params(next(keys), out_f)
        params["layers"].append({"w": w, "b": b, "bn_scale": bn_scale, "bn_shift": bn_shift})

    in_f = layer_hidden_dims[-1]
    bound = 1.0 / float(np.sqrt(in_f))
    params["out_w"] = jax.random.uniform(next(keys), (in_f, num_classes), jnp.float32, -bound, bound)
    params["out_b"] = jax.random.uniform(next(keys), (1, num_classes), jnp.float32, -bound, bound)

    params["embedding_size"] = embedding_size
    params["num_continuous"] = num_continuous
    params["num_classes"] = num_classes
    return params


def prepare_kernel_params(raw, *, weight_dtype=jnp.bfloat16):
    """Fold eval-mode BN affines + the embedding tables into the Linear weights, zero-pad feature
    dims to the 128-lane boundary, and cast MXU weights to bf16 (biases stay f32)."""
    assert len(raw["layers"]) >= 1
    emb_size = raw["embedding_size"]
    num_cont = raw["num_continuous"]
    s_c = raw["cont_bn_scale"][0]          # (num_cont,)
    t_c = raw["cont_bn_shift"]             # (1, num_cont)

    # ---- layer 0: fuse the embedding lookup (blockdiag(tables) @ W0_emb) and the cont-BN ----
    layer0 = raw["layers"][0]
    w0, b0 = layer0["w"], layer0["b"]
    w0_emb, w0_cont = w0[:emb_size, :], w0[emb_size:, :]

    cards = [int(t.shape[0]) for t in raw["embeddings"]]
    dims = [int(t.shape[1]) for t in raw["embeddings"]]
    cat_offsets = tuple(int(x) for x in np.cumsum([0] + cards[:-1]))

    rows, eoff = [], 0
    for tbl, d in zip(raw["embeddings"], dims):
        rows.append(tbl @ w0_emb[eoff:eoff + d, :])    # (card_i, H0)
        eoff += d
    w_mh = jnp.concatenate(rows, axis=0)               # (sum_cards, H0)
    b0 = b0 + t_c @ w0_cont                            # fold cont-BN shift into bias
    w_cont = s_c[:, None] * w0_cont                    # fold cont-BN scale into weights

    H0 = w0.shape[1]
    H0p = _round_up(H0, _LANE)
    K_mh = _round_up(sum(cards), _LANE)                # keep padding at 128 (HBM-bound regime)
    K_ct = max(8, _round_up(num_cont, 8))
    w_mh_p = jnp.zeros((K_mh, H0p), jnp.float32).at[:w_mh.shape[0], :H0].set(w_mh)
    w_ct_p = jnp.zeros((K_ct, H0p), jnp.float32).at[:num_cont, :H0].set(w_cont)
    b0_p = jnp.zeros((1, H0p), jnp.float32).at[:, :H0].set(b0)

    prev_s, prev_t = layer0["bn_scale"][0], layer0["bn_shift"]

    # ---- hidden layers 1.. and output layer: fold the previous layer's post-ReLU BN in ----
    folded = []
    for layer in raw["layers"][1:]:
        w, b = layer["w"], layer["b"]
        b = b + prev_t @ w
        w = prev_s[:, None] * w
        folded.append((w, b))
        prev_s, prev_t = layer["bn_scale"][0], layer["bn_shift"]
    wo, bo = raw["out_w"], raw["out_b"]
    bo = bo + prev_t @ wo
    wo = prev_s[:, None] * wo
    folded.append((wo, bo))

    padded = []
    for w, b in folded:
        ip, op = _round_up(w.shape[0], _LANE), _round_up(w.shape[1], _LANE)
        wp = jnp.zeros((ip, op), jnp.float32).at[:w.shape[0], :w.shape[1]].set(w)
        bp = jnp.zeros((1, op), jnp.float32).at[:, :b.shape[1]].set(b)
        padded.append((wp.astype(weight_dtype), bp))

    return {
        "cat_offsets": cat_offsets,
        "num_cat": len(cards),
        "num_cont": num_cont,
        "cont_cols": K_ct,
        "layer0": (w_mh_p.astype(weight_dtype), w_ct_p.astype(weight_dtype), b0_p),
        "layers": padded,                  # hidden layers 1.. plus the output layer
        "num_classes": raw["num_classes"],
    }


# ---------------------------------------------------------------------------
# Forward pass (matches MLP.forward in eval mode)
# ---------------------------------------------------------------------------
def mlp_forward(kparams, x_cat, x_cont, *, block_b=2048):
    B = x_cat.shape[0]
    num_cat = kparams["num_cat"]
    nc_real = kparams["num_cont"]
    K_ct = kparams["cont_cols"]
    w_mh, w_ct, b0 = kparams["layer0"]
    Cp = kparams["layers"][-1][0].shape[1]     # padded class dim (128-multiple, lane-dense)
    num_layers = 1 + len(kparams["layers"])

    TB, Bp = _choose_batch_tiling(B, block_b)

    # Only tiny raw inputs touch HBM before the kernel: int32 ids + raw continuous features.
    # Gather, BN, concat, padding and the bf16 cast all happen on-chip inside the kernel.
    x_cat = x_cat.astype(jnp.int32)
    if Bp != B:
        x_cat = jnp.pad(x_cat, ((0, Bp - B), (0, 0)))
    x_cont = jnp.pad(x_cont.astype(jnp.float32), ((0, Bp - B), (0, K_ct - nc_real)))

    operands = [x_cat, x_cont, w_mh, w_ct, b0]
    in_specs = [
        pl.BlockSpec((TB, num_cat), lambda i: (i, 0)),
        pl.BlockSpec((TB, K_ct), lambda i: (i, 0)),
        _resident_spec(w_mh.shape),
        _resident_spec(w_ct.shape),
        _resident_spec(b0.shape),
    ]
    # TODO(synk): if realistic hidden/input dims push the folded weight stack past the per-TC
    # VMEM budget (v7x: 64 MiB), K-tile layer 0 with a trailing "arbitrary" reduction axis
    # instead of keeping every weight resident.
    for w, b in kparams["layers"]:
        operands += [w, b]
        in_specs += [_resident_spec(w.shape), _resident_spec(b.shape)]

    out = pl.pallas_call(
        functools.partial(
            _mlp_fused_kernel,
            num_layers=num_layers,
            num_cat=num_cat,
            cat_offsets=kparams["cat_offsets"],
        ),
        # bf16 output halves the (dominant) output HBM traffic; a (TB, num_classes)-narrow block
        # is a further option but needs benchmarking of the masked-store cost.
        out_shape=jax.ShapeDtypeStruct((Bp, Cp), jnp.bfloat16),
        grid=(Bp // TB,),
        in_specs=in_specs,
        out_specs=pl.BlockSpec((TB, Cp), lambda i: (i, 0)),
        compiler_params=pltpu.CompilerParams(
            dimension_semantics=("parallel",),          # megacore-shard the batch axis (v7x)
            vmem_limit_bytes=_vmem_limit_bytes(),
        ),
    )(*operands)

    # Strip batch/lane padding; cast the tiny logit slab back to f32 for the caller.
    return out[:B, :kparams["num_classes"]].astype(jnp.float32)


def mlp_reference(raw, x_cat, x_cont):
    """Pure-JAX f32 reference matching the PyTorch module in eval mode (unfolded params)."""
    embs = [jnp.take(tbl, x_cat[:, i], axis=0) for i, tbl in enumerate(raw["embeddings"])]
    xc = x_cont * raw["cont_bn_scale"] + raw["cont_bn_shift"]
    x = jnp.concatenate(embs + [xc], axis=1)
    for layer in raw["layers"]:
        x = jnp.maximum(x @ layer["w"] + layer["b"], 0.0)
        x = x * layer["bn_scale"] + layer["bn_shift"]
    return x @ raw["out_w"] + raw["out_b"]


# ---------------------------------------------------------------------------
if __name__ == "__main__":
    embedding_table_shapes = {"cat_a": (10, 8), "cat_b": (7, 8), "cat_c": (5, 16)}  # emb size = 32
    num_continuous = 4
    layer_hidden_dims = [32, 16]
    num_classes = 3
    batch = 8

    key = jax.random.PRNGKey(0)
    k_params, k_cat, k_cont = jax.random.split(key, 3)

    raw_params = init_params(
        k_params, embedding_table_shapes, num_continuous, layer_hidden_dims, num_classes
    )
    kparams = prepare_kernel_params(raw_params)
    cards = [c for c, _ in embedding_table_shapes.values()]

    def make_inputs(kc, kn, b):
        x_cat = jnp.stack(
            [jax.random.randint(jax.random.fold_in(kc, i), (b,), 0, card)
             for i, card in enumerate(cards)],
            axis=1,
        ).astype(jnp.int32)
        x_cont = jax.random.normal(kn, (b, num_continuous), jnp.float32)
        return x_cat, x_cont

    # Small single-tile check (batch=8).
    x_cat, x_cont = make_inputs(k_cat, k_cont, batch)
    fwd = jax.jit(lambda xc, xn: mlp_forward(kparams, xc, xn, block_b=2048))
    out = jax.block_until_ready(fwd(x_cat, x_cont))
    assert out.shape == (batch, num_classes), out.shape
    assert out.dtype == jnp.float32
    ref = mlp_reference(raw_params, x_cat, x_cont)
    np.testing.assert_allclose(np.asarray(out), np.asarray(ref), rtol=5e-2, atol=5e-2)

    # Multi-tile / megacore path: non-multiple batch -> O(8)-row padding, grid of 4 steps.
    xc2, xn2 = make_inputs(jax.random.fold_in(k_cat, 100), jax.random.fold_in(k_cont, 100), 200)
    out2 = jax.block_until_ready(mlp_forward(kparams, xc2, xn2, block_b=64))
    assert out2.shape == (200, num_classes), out2.shape
    ref2 = mlp_reference(raw_params, xc2, xn2)
    np.testing.assert_allclose(np.asarray(out2), np.asarray(ref2), rtol=5e-2, atol=5e-2)

    print("KERNEL_OK")
</pallas_src>

<mosaic_0001>
module attributes {stable_mosaic.version = 11 : i64} {
  func.func @_k(%arg0: i32, %arg1: memref<8x128xf32, #tpu.memory_space<vmem>>, %arg2: memref<8x128xf32, #tpu.memory_space<vmem>>) attributes {dimension_semantics = [#tpu.dimension_semantics<arbitrary>], iteration_bounds = array<i64: 1>, scalar_prefetch = 0 : i64, scratch_operands = 0 : i64, tpu.core_type = #tpu.core_type<tc>, window_params = [{pipeline_mode = #tpu.pipeline_mode<synchronous>, transform_indices = @transform_0, window_bounds = array<i64: 8, 128>}, {pipeline_mode = #tpu.pipeline_mode<synchronous>, transform_indices = @transform_1, window_bounds = array<i64: 8, 128>}]} {
    %c0 = arith.constant 0 : index
    %c0_0 = arith.constant 0 : index
    %0 = vector.load %arg1[%c0, %c0_0] : memref<8x128xf32, #tpu.memory_space<vmem>>, vector<8x128xf32>
    %cst = arith.constant 2.000000e+00 : f32
    %1 = vector.broadcast %cst : f32 to vector<8x128xf32>
    %2 = arith.mulf %0, %1 : vector<8x128xf32>
    %c0_1 = arith.constant 0 : index
    %c0_2 = arith.constant 0 : index
    %3 = vector.load %arg2[%c0_1, %c0_2] : memref<8x128xf32, #tpu.memory_space<vmem>>, vector<8x128xf32>
    tpu.vector_store %arg2[%c0_1, %c0_2], %2 {strides = array<i32>} : memref<8x128xf32, #tpu.memory_space<vmem>>, vector<8x128xf32>,
    return
  }
  func.func @transform_0(%arg0: i32) -> (i32, i32) {
    %c0_i32 = arith.constant 0 : i32
    %c0_i32_0 = arith.constant 0 : i32
    %c0_i32_1 = arith.constant 0 : i32
    return %c0_i32, %c0_i32_0 : i32, i32
  }
  func.func @transform_1(%arg0: i32) -> (i32, i32) {
    %c0_i32 = arith.constant 0 : i32
    %c0_i32_0 = arith.constant 0 : i32
    %c0_i32_1 = arith.constant 0 : i32
    return %c0_i32, %c0_i32_0 : i32, i32
  }
}

module attributes {stable_mosaic.version = 11 : i64} {
  func.func @_mlp_fused_kernel(%arg0: i32, %arg1: memref<8x3xi32, #tpu.memory_space<vmem>>, %arg2: memref<8x8xf32, #tpu.memory_space<vmem>>, %arg3: memref<128x128xbf16, #tpu.memory_space<vmem>>, %arg4: memref<8x128xbf16, #tpu.memory_space<vmem>>, %arg5: memref<1x128xf32, #tpu.memory_space<vmem>>, %arg6: memref<128x128xbf16, #tpu.memory_space<vmem>>, %arg7: memref<1x128xf32, #tpu.memory_space<vmem>>, %arg8: memref<128x128xbf16, #tpu.memory_space<vmem>>, %arg9: memref<1x128xf32, #tpu.memory_space<vmem>>, %arg10: memref<8x128xbf16, #tpu.memory_space<vmem>>) attributes {dimension_semantics = [#tpu.dimension_semantics<parallel>], iteration_bounds = array<i64: 1>, scalar_prefetch = 0 : i64, scratch_operands = 0 : i64, tpu.core_type = #tpu.core_type<tc>, window_params = [{transform_indices = @transform_0, window_bounds = array<i64: 8, 3>}, {transform_indices = @transform_1, window_bounds = array<i64: 8, 8>}, {pipeline_mode = #tpu.pipeline_mode<synchronous>, transform_indices = @transform_2, window_bounds = array<i64: 128, 128>}, {pipeline_mode = #tpu.pipeline_mode<synchronous>, transform_indices = @transform_3, window_bounds = array<i64: 8, 128>}, {pipeline_mode = #tpu.pipeline_mode<synchronous>, transform_indices = @transform_4, window_bounds = array<i64: 1, 128>}, {pipeline_mode = #tpu.pipeline_mode<synchronous>, transform_indices = @transform_5, window_bounds = array<i64: 128, 128>}, {pipeline_mode = #tpu.pipeline_mode<synchronous>, transform_indices = @transform_6, window_bounds = array<i64: 1, 128>}, {pipeline_mode = #tpu.pipeline_mode<synchronous>, transform_indices = @transform_7, window_bounds = array<i64: 128, 128>}, {pipeline_mode = #tpu.pipeline_mode<synchronous>, transform_indices = @transform_8, window_bounds = array<i64: 1, 128>}, {transform_indices = @transform_9, window_bounds = array<i64: 8, 128>}]} {
    %0 = tpu.iota {dimensions = array<i32: 1>} : vector<8x128xi32>
    %c0 = arith.constant 0 : index
    %c0_0 = arith.constant 0 : index
    %1 = vector.load %arg1[%c0, %c0_0] : memref<8x3xi32, #tpu.memory_space<vmem>>, vector<8x1xi32>
    %c0_i32 = arith.constant 0 : i32
    %2 = vector.broadcast %c0_i32 : i32 to vector<8x1xi32>
    %3 = arith.addi %1, %2 : vector<8x1xi32>
    %4 = vector.broadcast %3 : vector<8x1xi32> to vector<8x128xi32>
    %5 = arith.cmpi eq, %0, %4 : vector<8x128xi32>
    %c0_1 = arith.constant 0 : index
    %c1 = arith.constant 1 : index
    %6 = vector.load %arg1[%c0_1, %c1] : memref<8x3xi32, #tpu.memory_space<vmem>>, vector<8x1xi32>
    %c10_i32 = arith.constant 10 : i32
    %7 = vector.broadcast %c10_i32 : i32 to vector<8x1xi32>
    %8 = arith.addi %6, %7 : vector<8x1xi32>
    %9 = vector.broadcast %8 : vector<8x1xi32> to vector<8x128xi32>
    %10 = arith.cmpi eq, %0, %9 : vector<8x128xi32>
    %11 = arith.ori %5, %10 : vector<8x128xi1>
    %c0_2 = arith.constant 0 : index
    %c2 = arith.constant 2 : index
    %12 = vector.load %arg1[%c0_2, %c2] : memref<8x3xi32, #tpu.memory_space<vmem>>, vector<8x1xi32>
    %c17_i32 = arith.constant 17 : i32
    %13 = vector.broadcast %c17_i32 : i32 to vector<8x1xi32>
    %14 = arith.addi %12, %13 : vector<8x1xi32>
    %15 = vector.broadcast %14 : vector<8x1xi32> to vector<8x128xi32>
    %16 = arith.cmpi eq, %0, %15 : vector<8x128xi32>
    %17 = arith.ori %11, %16 : vector<8x128xi1>
    %18 = arith.extui %17 : vector<8x128xi1> to vector<8x128xi32>
    %19 = arith.sitofp %18 : vector<8x128xi32> to vector<8x128xf32>
    %20 = arith.truncf %19 : vector<8x128xf32> to vector<8x128xbf16>
    %c0_3 = arith.constant 0 : index
    %c0_4 = arith.constant 0 : index
    %21 = vector.load %arg3[%c0_3, %c0_4] : memref<128x128xbf16, #tpu.memory_space<vmem>>, vector<128x128xbf16>
    %cst = arith.constant dense<0.000000e+00> : vector<8x128xf32>
    %22 = tpu.matmul %20, %21, %cst {dimension_numbers = #tpu.dot_dimension_numbers<[1], [0], [0], [1], [0, 0, 1, 1], [], []>} : vector<8x128xbf16>, vector<128x128xbf16>, vector<8x128xf32> -> vector<8x128xf32>
    %c0_5 = arith.constant 0 : index
    %c0_6 = arith.constant 0 : index
    %23 = vector.load %arg2[%c0_5, %c0_6] : memref<8x8xf32, #tpu.memory_space<vmem>>, vector<8x8xf32>
    %24 = arith.truncf %23 : vector<8x8xf32> to vector<8x8xbf16>
    %c0_7 = arith.constant 0 : index
    %c0_8 = arith.constant 0 : index
    %25 = vector.load %arg4[%c0_7, %c0_8] : memref<8x128xbf16, #tpu.memory_space<vmem>>, vector<8x128xbf16>
    %cst_9 = arith.constant dense<0.000000e+00> : vector<8x128xf32>
    %26 = tpu.matmul %24, %25, %cst_9 {dimension_numbers = #tpu.dot_dimension_numbers<[1], [0], [0], [1], [0, 0, 1, 1], [], []>} : vector<8x8xbf16>, vector<8x128xbf16>, vector<8x128xf32> -> vector<8x128xf32>
    %27 = arith.addf %22, %26 : vector<8x128xf32>
    %c0_10 = arith.constant 0 : index
    %c0_11 = arith.constant 0 : index
    %28 = vector.load %arg5[%c0_10, %c0_11] : memref<1x128xf32, #tpu.memory_space<vmem>>, vector<1x128xf32>
    %29 = vector.broadcast %28 : vector<1x128xf32> to vector<8x128xf32>
    %30 = arith.addf %27, %29 : vector<8x128xf32>
    %cst_12 = arith.constant 0.000000e+00 : f32
    %31 = vector.broadcast %cst_12 : f32 to vector<8x128xf32>
    %32 = arith.maximumf %30, %31 : vector<8x128xf32>
    %33 = arith.truncf %32 : vector<8x128xf32> to vector<8x128xbf16>
    %c0_13 = arith.constant 0 : index
    %c0_14 = arith.constant 0 : index
    %34 = vector.load %arg6[%c0_13, %c0_14] : memref<128x128xbf16, #tpu.memory_space<vmem>>, vector<128x128xbf16>
    %cst_15 = arith.constant dense<0.000000e+00> : vector<8x128xf32>
    %35 = tpu.matmul %33, %34, %cst_15 {dimension_numbers = #tpu.dot_dimension_numbers<[1], [0], [0], [1], [0, 0, 1, 1], [], []>} : vector<8x128xbf16>, vector<128x128xbf16>, vector<8x128xf32> -> vector<8x128xf32>
    %c0_16 = arith.constant 0 : index
    %c0_17 = arith.constant 0 : index
    %36 = vector.load %arg7[%c0_16, %c0_17] : memref<1x128xf32, #tpu.memory_space<vmem>>, vector<1x128xf32>
    %37 = vector.broadcast %36 : vector<1x128xf32> to vector<8x128xf32>
    %38 = arith.addf %35, %37 : vector<8x128xf32>
    %cst_18 = arith.constant 0.000000e+00 : f32
    %39 = vector.broadcast %cst_18 : f32 to vector<8x128xf32>
    %40 = arith.maximumf %38, %39 : vector<8x128xf32>
    %41 = arith.truncf %40 : vector<8x128xf32> to vector<8x128xbf16>
    %c0_19 = arith.constant 0 : index
    %c0_20 = arith.constant 0 : index
    %42 = vector.load %arg8[%c0_19, %c0_20] : memref<128x128xbf16, #tpu.memory_space<vmem>>, vector<128x128xbf16>
    %cst_21 = arith.constant dense<0.000000e+00> : vector<8x128xf32>
    %43 = tpu.matmul %41, %42, %cst_21 {dimension_numbers = #tpu.dot_dimension_numbers<[1], [0], [0], [1], [0, 0, 1, 1], [], []>} : vector<8x128xbf16>, vector<128x128xbf16>, vector<8x128xf32> -> vector<8x128xf32>
    %c0_22 = arith.constant 0 : index
    %c0_23 = arith.constant 0 : index
    %44 = vector.load %arg9[%c0_22, %c0_23] : memref<1x128xf32, #tpu.memory_space<vmem>>, vector<1x128xf32>
    %45 = vector.broadcast %44 : vector<1x128xf32> to vector<8x128xf32>
    %46 = arith.addf %43, %45 : vector<8x128xf32>
    %47 = arith.truncf %46 : vector<8x128xf32> to vector<8x128xbf16>
    %c0_24 = arith.constant 0 : index
    %c0_25 = arith.constant 0 : index
    %48 = vector.load %arg10[%c0_24, %c0_25] : memref<8x128xbf16, #tpu.memory_space<vmem>>, vector<8x128xbf16>
    tpu.vector_store %arg10[%c0_24, %c0_25], %47 {strides = array<i32>} : memref<8x128xbf16, #tpu.memory_space<vmem>>, vector<8x128xbf16>,
    return
  }
  func.func @transform_0(%arg0: i32) -> (i32, i32) {
    %c0_i32 = arith.constant 0 : i32
    %c0_i32_0 = arith.constant 0 : i32
    return %arg0, %c0_i32 : i32, i32
  }
  func.func @transform_1(%arg0: i32) -> (i32, i32) {
    %c0_i32 = arith.constant 0 : i32
    %c0_i32_0 = arith.constant 0 : i32
    return %arg0, %c0_i32 : i32, i32
  }
  func.func @transform_2(%arg0: i32) -> (i32, i32) {
    %c0_i32 = arith.constant 0 : i32
    %c0_i32_0 = arith.constant 0 : i32
    %c0_i32_1 = arith.constant 0 : i32
    return %c0_i32, %c0_i32_0 : i32, i32
  }
  func.func @transform_3(%arg0: i32) -> (i32, i32) {
    %c0_i32 = arith.constant 0 : i32
    %c0_i32_0 = arith.constant 0 : i32
    %c0_i32_1 = arith.constant 0 : i32
    return %c0_i32, %c0_i32_0 : i32, i32
  }
  func.func @transform_4(%arg0: i32) -> (i32, i32) {
    %c0_i32 = arith.constant 0 : i32
    %c0_i32_0 = arith.constant 0 : i32
    %c0_i32_1 = arith.constant 0 : i32
    return %c0_i32, %c0_i32_0 : i32, i32
  }
  func.func @transform_5(%arg0: i32) -> (i32, i32) {
    %c0_i32 = arith.constant 0 : i32
    %c0_i32_0 = arith.constant 0 : i32
    %c0_i32_1 = arith.constant 0 : i32
    return %c0_i32, %c0_i32_0 : i32, i32
  }
  func.func @transform_6(%arg0: i32) -> (i32, i32) {
    %c0_i32 = arith.constant 0 : i32
    %c0_i32_0 = arith.constant 0 : i32
    %c0_i32_1 = arith.constant 0 : i32
    return %c0_i32, %c0_i32_0 : i32, i32
  }
  func.func @transform_7(%arg0: i32) -> (i32, i32) {
    %c0_i32 = arith.constant 0 : i32
    %c0_i32_0 = arith.constant 0 : i32
    %c0_i32_1 = arith.constant 0 : i32
    return %c0_i32, %c0_i32_0 : i32, i32
  }
  func.func @transform_8(%arg0: i32) -> (i32, i32) {
    %c0_i32 = arith.constant 0 : i32
    %c0_i32_0 = arith.constant 0 : i32
    %c0_i32_1 = arith.constant 0 : i32
    return %c0_i32, %c0_i32_0 : i32, i32
  }
  func.func @transform_9(%arg0: i32) -> (i32, i32) {
    %c0_i32 = arith.constant 0 : i32
    %c0_i32_0 = arith.constant 0 : i32
    return %arg0, %c0_i32 : i32, i32
  }
}

</mosaic_0001>

<bundles_post_ra>
// kernel: tpu_custom_call.1
= control target key start
LH: loop header
LB: loop body
LE: loop exit
PB: predicated region body
PF: predicated region fallthrough
CT: control target
= control target key end

     0   :  { %6 = vsyncpa [#allocation3], 0  ;;  %s125_s0 = inlined_call_operand.hbm [shape: f32[8,128], index: 0, kind: input, shape index: {}]   ;;  %s126_s1 = inlined_call_operand.hbm [shape: f32[8,128], index: 1, kind: output, shape index: {}]  }
   0x1   :  { %7 = vsyncpa [#allocation4], 0  ;;  %s89_s6 = smov [#allocation2]   ;;  %s41_s10 = scalar_lea.hbm %s125_s0, 128 }
   0x2   :  { %s14_s7 = sshll.u32 %s89_s6, 4  ;;  %p42_p0 = scmp.ne.s32.totalorder %s125_s0, %s41_s10  ;;  %s15_s7 = int_to_ptr.vmem [resolvable:$true] %s14_s7 }
   0x3   :  { %p45_p1 = scmp.lt.u32.totalorder %s41_s10, %s125_s0 }
   0x5   :  { %p47_p2 = pnand %p45_p1, %p42_p0 }
   0x7   :  { %50 = shalt.err (!%p47_p2)
}
   0x8   :  { %s51_s15 = scalar_lea.vmem %s15_s7, 128  ;;  %p56_p4 = scmp.lt.s32.totalorder %s15_s7, %s15_s7 }
   0x9   :  { %p52_p3 = scmp.ne.s32.totalorder %s15_s7, %s51_s15  ;;  %p57_p5 = scmp.lt.s32.totalorder %s51_s15, %s51_s15 }
   0xb   :  { %p58_p6 = por %p57_p5, %p56_p4 }
   0xd   :  { %p59_p7 = pnand %p58_p6, %p52_p3 }
   0xf   :  { %62 = shalt.err (!%p59_p7)
}
  0x10   :  { %17 = dma.hbm_to_vmem [thread:$0]  %s125_s0, 128, %s15_s7, [#allocation3]  }
  0x11   :  { %85 = dma.done.wait [#allocation3], 128  }
  0x12   :  { %86 = vsyncadd [#allocation3], 4294967168  ;;  %s90_s18 = smov [#allocation5]   ;;  %v21_v0 = vld [vmem:[#allocation2] sm:$0xff] }
  0x13   :  { %s30_s19 = sshll.u32 %s90_s18, 4  ;;  %v22_v1 = vmul.f32 2.0, %v21_v0  ;;  %s31_s19 = int_to_ptr.vmem [resolvable:$true] %s30_s19 }
  0x14   :  { %s63_s20 = scalar_lea.vmem %s31_s19, 128  ;;  %p68_p9 = scmp.lt.s32.totalorder %s31_s19, %s31_s19 }
  0x15   :  { %23 = vst [vmem:[#allocation5] sm:$0xff] %v22_v1  ;;  %p64_p8 = scmp.ne.s32.totalorder %s31_s19, %s63_s20  ;;  %p69_p10 = scmp.lt.s32.totalorder %s63_s20, %s63_s20 }
  0x17   :  { %p70_p11 = por %p69_p10, %p68_p9 }
  0x19   :  { %p71_p12 = pnand %p70_p11, %p64_p8 }
  0x1b   :  { %74 = shalt.err (!%p71_p12)
}
  0x1c   :  { %s75_s23 = scalar_lea.hbm %s126_s1, 128 }
  0x1d   :  { %p76_p13 = scmp.ne.s32.totalorder %s126_s1, %s75_s23  ;;  %p79_p0 = scmp.lt.u32.totalorder %s75_s23, %s126_s1 }
  0x1f   :  { %p81_p1 = pnand %p79_p0, %p76_p13 }
  0x21   :  { %84 = shalt.err (!%p81_p1)
}
  0x22   :  { %33 = dma.vmem_to_hbm [thread:$0]  %s31_s19, 128, %s126_s1, [#allocation4]  }
  0x23   :  { %87 = dma.done.wait [#allocation4], 128  }
  0x24   :  { %88 = vsyncadd [#allocation4], 4294967168 }
  0x25   :  { %37 = vsyncpa [#allocation3], 1 }
  0x26   :  { %38 = vsyncpa [#allocation4], 1 }

// kernel: _lambda_.1
= control target key start
LH: loop header
LB: loop body
LE: loop exit
PB: predicated region body
PF: predicated region fallthrough
CT: control target
= control target key end

     0   :  { %14 = vsyncpa [#allocation3], 0  ;;  %s854_s0 = inlined_call_operand.vmem [shape: s32[8,3], index: 0, kind: input, shape index: {}]   ;;  %s855_s1 = inlined_call_operand.vmem [shape: f32[8,8], index: 1, kind: input, shape index: {}]   ;;  %s856_s2 = inlined_call_operand.vmem [shape: bf16[128,128], index: 2, kind: input, shape index: {}]   ;;  %s857_s3 = inlined_call_operand.vmem [shape: bf16[8,128], index: 3, kind: input, shape index: {}]   ;;  %s858_s4 = inlined_call_operand.vmem [shape: f32[1,128], index: 4, kind: input, shape index: {}]   ;;  %s859_s5 = inlined_call_operand.hbm [shape: bf16[128,128], index: 5, kind: input, shape index: {}]   ;;  %s860_s6 = inlined_call_operand.vmem [shape: f32[1,128], index: 6, kind: input, shape index: {}]   ;;  %s861_s7 = inlined_call_operand.hbm [shape: bf16[128,128], index: 7, kind: input, shape index: {}]   ;;  %s862_s8 = inlined_call_operand.vmem [shape: f32[1,128], index: 8, kind: input, shape index: {}]   ;;  %s863_s9 = inlined_call_operand.vmem [shape: bf16[8,128], index: 9, kind: output, shape index: {}]  }
   0x1   :  { %15 = vsyncpa [#allocation5], 0  ;;  %s692_s30 = smov [#allocation2]   ;;  %s644_s13 = scalar_lea.hbm %s859_s5, 1024 }
   0x2   :  { %s31_s10 = sshll.u32 %s692_s30, 4  ;;  %p645_p0 = scmp.ne.s32.totalorder %s859_s5, %s644_s13  ;;  %s32_s10 = int_to_ptr.vmem [resolvable:$true] %s31_s10 }
   0x3   :  { %p648_p1 = scmp.lt.u32.totalorder %s644_s13, %s859_s5 }
   0x5   :  { %p650_p2 = pnand %p648_p1, %p645_p0 }
   0x7   :  { %653 = shalt.err (!%p650_p2)
}
   0x8   :  { %s654_s18 = scalar_lea.vmem %s32_s10, 1024  ;;  %p659_p4 = scmp.lt.s32.totalorder %s32_s10, %s32_s10 }
   0x9   :  { %p655_p3 = scmp.ne.s32.totalorder %s32_s10, %s654_s18  ;;  %p660_p5 = scmp.lt.s32.totalorder %s654_s18, %s654_s18 }
   0xb   :  { %p661_p6 = por %p660_p5, %p659_p4 }
   0xd   :  { %p662_p7 = pnand %p661_p6, %p655_p3 }
   0xf   :  { %665 = shalt.err (!%p662_p7)
}
  0x10   :  { %s693_s19 = smov 64   ;;  %s694_s20 = smov 4  }
  0x11   :  { %37 = dma.hbm_to_vmem [thread:$0]  %s859_s5, 1024, %s32_s10, [#allocation3], %s693_s19, %s693_s19, %s694_s20  }
  0x12   :  { %s695_s23 = smov [#allocation4]   ;;  %s666_s27 = scalar_lea.hbm %s861_s7, 1024 }
  0x13   :  { %s45_s24 = sshll.u32 %s695_s23, 4  ;;  %p667_p8 = scmp.ne.s32.totalorder %s861_s7, %s666_s27  ;;  %s46_s24 = int_to_ptr.vmem [resolvable:$true] %s45_s24 }
  0x14   :  { %p670_p9 = scmp.lt.u32.totalorder %s666_s27, %s861_s7 }
  0x16   :  { %p672_p10 = pnand %p670_p9, %p667_p8 }
  0x18   :  { %675 = shalt.err (!%p672_p10)
}
  0x19   :  { %s676_s12 = scalar_lea.vmem %s46_s24, 1024  ;;  %p681_p12 = scmp.lt.s32.totalorder %s46_s24, %s46_s24 }
  0x1a   :  { %p677_p11 = scmp.ne.s32.totalorder %s46_s24, %s676_s12  ;;  %p682_p13 = scmp.lt.s32.totalorder %s676_s12, %s676_s12 }
  0x1c   :  { %p683_p0 = por %p682_p13, %p681_p12 }
  0x1e   :  { %p684_p1 = pnand %p683_p0, %p677_p11 }
  0x20   :  { %687 = shalt.err (!%p684_p1)
}
  0x21   :  { %51 = dma.hbm_to_vmem [thread:$0]  %s861_s7, 1024, %s46_s24, [#allocation5], %s693_s19, %s693_s19, %s694_s20  }
  0x22   :  { %688 = dma.done.wait [#allocation3], 1024  }
  0x23   :  { %689 = vsyncadd [#allocation3], 4294966272 }
  0x24   :  { %690 = dma.done.wait [#allocation5], 1024  }
  0x25   :  { %691 = vsyncadd [#allocation5], 4294966272  ;;  %v696_v0 = vmov 0   ;;  %v697_v1 = vmov 2   ;;  %v698_v2 = vmov 0.0   ;;  %v63_v3 = vld [vmem:[%s854_s0] sm:$0xff]  ;;  %v61_v25 = vlaneseq }
  0x26   :  { %616 = vset.pattern.permute.xlu0 %v696_v0  ;;  %618 = vset.pattern.permute.xlu1 %v697_v1  ;;  %v68_v4 = vadd.s32 10, %v63_v3  ;;  %v74_v5 = vadd.s32 17, %v63_v3  ;;  %v620_v6 = vld [vmem:[%s856_s2] sm:$0xff]   ;;  %v621_v7 = vld [vmem:[%s856_s2 + $0x8] sm:$0xff]   ;;  %v699_v8 = vmov 1   ;;  %vm106_vm0 = vcmask 1043456  }
  0x27   :  { %546 = vmatprep.subr.bf16.mxu1 %v698_v2  ;;  %540 = vmatprep.subr.bf16.mxu0 %v698_v2  ;;  %vm700_vm1 = vmmov 0   ;;  %v622_v9 = vld [vmem:[%s856_s2 + $0x10] sm:$0xff]   ;;  %v101_v10 = vld [vmem:[%s857_s3] sm:$0xf]  ;;  %vm102_vm2 = vcmask 64512   ;;  %v623_v15 = vld [vmem:[%s856_s2 + $0x18] sm:$0xff]  }
  0x28   :  { %65 = vperm.xlu0 %616, %v63_v3   ;;  %76 = vperm.xlu1 %618, %v74_v5   ;;  %v99_v11 = vld [vmem:[%s855_s1] sm:$0xff]  ;;  %v108_v12 = vsel %vm106_vm0, %v101_v10, 0  ;;  %v629_v16 = vld [vmem:[#allocation2 + $0x8] sm:$0xff]   ;;  %v630_v18 = vld [vmem:[#allocation2 + $0x10] sm:$0xff]   ;;  %v62_v27 = vand.u32 127, %v61_v25 }
  0x29   :  { %547 = vmatpush3.bf16.msra.mxu1 %v620_v6  ;;  %542 = vmatprep.mubr.msk.bf16.mxu0 %vm700_vm1, %v698_v2  ;;  %v100_v13 = vpack.c.bf16 %v99_v11, %v99_v11  ;;  %v628_v14 = vld [vmem:[#allocation2] sm:$0xff]   ;;  %v625_v19 = vld [vmem:[%s856_s2 + $0x28] sm:$0xff]   ;;  %v631_v20 = vld [vmem:[#allocation2 + $0x18] sm:$0xff]   ;;  %v701_v30 = vmov 1.0|1.0  }
  0x2a   :  { %548 = vmatprep.subr.bf16.mxu1 %v698_v2  ;;  %562 = vmatprep.mubr.msk.bf16.mxu1 %vm700_vm1, %v698_v2  ;;  %v624_v17 = vld [vmem:[%s856_s2 + $0x20] sm:$0xff]   ;;  %v626_v21 = vld [vmem:[%s856_s2 + $0x30] sm:$0xff]   ;;  %v627_v23 = vld [vmem:[%s856_s2 + $0x38] sm:$0xff]  }
  0x2b   :  { %541 = vmatpush3.bf16.msra.mxu0 %v108_v12  ;;  %v632_v22 = vld [vmem:[#allocation2 + $0x20] sm:$0xff]   ;;  %v633_v24 = vld [vmem:[#allocation2 + $0x28] sm:$0xff]   ;;  %v634_v31 = vld [vmem:[#allocation2 + $0x30] sm:$0xff]  }
  0x2c   :  { %617 = vset.pattern.permute.xlu0 %v699_v8  ;;  %566 = vmatprep.subr.bf16.mxu0 %v698_v2  ;;  %v635_v35 = vld [vmem:[#allocation2 + $0x38] sm:$0xff]   ;;  %v636_v37 = vld [vmem:[#allocation4] sm:$0xff]   ;;  %v637_v38 = vld [vmem:[#allocation4 + $0x8] sm:$0xff]  }
  0x2d   :  { %70 = vperm.xlu0 %617, %v68_v4   ;;  %549 = vmatpush3.bf16.msra.mxu1 %v621_v7  ;;  %v638_v39 = vld [vmem:[#allocation4 + $0x10] sm:$0xff]   ;;  %v639_v40 = vld [vmem:[#allocation4 + $0x18] sm:$0xff]   ;;  %v640_v41 = vld [vmem:[#allocation4 + $0x20] sm:$0xff]  }
  0x2e   :  { %550 = vmatprep.subr.bf16.mxu1 %v698_v2  ;;  %543 = vmatmul.mubr.msk.bf16.vlgmr.msra.gmra.mrb[0].mxu0 %vm102_vm2, %v100_v13  ;;  %v641_v42 = vld [vmem:[#allocation4 + $0x28] sm:$0xff]   ;;  %v492_v44 = vld [vmem:[%s858_s4] ss:$0 sm:$0xff]  ;;  %v642_v52 = vld [vmem:[#allocation4 + $0x30] sm:$0xff]  }
  0x2f   :  { %567 = vmatpush3.bf16.msra.mxu0 %v628_v14  ;;  %582 = vmatprep.mubr.msk.bf16.mxu0 %vm700_vm1, %v698_v2  ;;  %v643_v53 = vld [vmem:[#allocation4 + $0x38] sm:$0xff]   ;;  %v493_v54 = vld [vmem:[%s860_s6] ss:$0 sm:$0xff] }
  0x30   :  { %568 = vmatprep.subr.bf16.mxu0 %v698_v2  ;;  %v502_v62 = vld [vmem:[%s862_s8] ss:$0 sm:$0xff] }
  0x31   :  { %619 = vset.pattern.permute.xlu0 %v697_v1  ;;  %551 = vmatpush3.bf16.msra.mxu1 %v622_v9 }
  0x32   :  { %552 = vmatprep.subr.bf16.mxu1 %v698_v2 }
  0x33   :  { %569 = vmatpush3.bf16.msra.mxu0 %v629_v16 }
  0x34   :  { %570 = vmatprep.subr.bf16.mxu0 %v698_v2 }
  0x35   :  { %553 = vmatpush3.bf16.msra.mxu1 %v623_v15 }
  0x36   :  { %554 = vmatprep.subr.bf16.mxu1 %v698_v2 }
  0x37   :  { %571 = vmatpush3.bf16.msra.mxu0 %v630_v18 }
  0x38   :  { %572 = vmatprep.subr.bf16.mxu0 %v698_v2 }
  0x39   :  { %555 = vmatpush3.bf16.msra.mxu1 %v624_v17 }
  0x3a   :  { %556 = vmatprep.subr.bf16.mxu1 %v698_v2 }
  0x3b   :  { %573 = vmatpush3.bf16.msra.mxu0 %v631_v20 }
  0x3c   :  { %574 = vmatprep.subr.bf16.mxu0 %v698_v2 }
  0x3d   :  { %557 = vmatpush3.bf16.msra.mxu1 %v625_v19 }
  0x3e   :  { %558 = vmatprep.subr.bf16.mxu1 %v698_v2 }
  0x3f   :  { %575 = vmatpush3.bf16.msra.mxu0 %v632_v22 }
  0x40   :  { %576 = vmatprep.subr.bf16.mxu0 %v698_v2 }
  0x41   :  { %559 = vmatpush3.bf16.msra.mxu1 %v626_v21 }
  0x42   :  { %560 = vmatprep.subr.bf16.mxu1 %v698_v2 }
  0x43   :  { %577 = vmatpush3.bf16.msra.mxu0 %v633_v24 }
  0x44   :  { %578 = vmatprep.subr.bf16.mxu0 %v698_v2 }
  0x45   :  { %561 = vmatpush3.bf16.msra.mxu1 %v627_v23 }
  0x46   :  { %586 = vmatprep.subr.bf16.mxu1 %v698_v2 }
  0x47   :  { %579 = vmatpush3.bf16.msra.mxu0 %v634_v31 }
  0x48   :  { %580 = vmatprep.subr.bf16.mxu0 %v698_v2 }
  0x4b   :  { %581 = vmatpush3.bf16.msra.mxu0 %v635_v35 }
  0xa7   :  { %v66_v26 = vpop.permute.xlu0 %65  ;;  %v77_v28 = vpop.permute.xlu1 %76 }
  0xa8   :  { %vm78_vm3 = vcmp.eq.s32.totalorder %v62_v27, %v77_v28  ;;  %vm67_vm4 = vcmp.eq.s32.totalorder %v62_v27, %v66_v26 }
  0xac   :  { %v71_v29 = vpop.permute.xlu0 %70 }
  0xad   :  { %vm72_vm5 = vcmp.eq.s32.totalorder %v62_v27, %v71_v29 }
  0xae   :  { %vm73_vm6 = vmor %vm67_vm4, %vm72_vm5 }
  0xaf   :  { %vm79_vm7 = vmor %vm73_vm6, %vm78_vm3 }
  0xb0   :  { %vm490_vm8 = vmpackc.low %vm79_vm7, %vm79_vm7 }
  0xb1   :  { %563 = vmatmul.mubr.msk.bf16.vlgmr.msra.gmra.mrb[0].mxu1 %vm490_vm8, %v701_v30 }
  0xb2   :  { %602 = vmatprep.mubr.msk.bf16.mxu1 %vm700_vm1, %v698_v2  ;;  %587 = vmatpush3.bf16.msra.mxu1 %v636_v37 }
  0xb3   :  { %588 = vmatprep.subr.bf16.mxu1 %v698_v2 }
  0xb6   :  { %589 = vmatpush3.bf16.msra.mxu1 %v637_v38 }
  0xb7   :  { %590 = vmatprep.subr.bf16.mxu1 %v698_v2 }
  0xba   :  { %591 = vmatpush3.bf16.msra.mxu1 %v638_v39 }
  0xbb   :  { %592 = vmatprep.subr.bf16.mxu1 %v698_v2 }
  0xbe   :  { %593 = vmatpush3.bf16.msra.mxu1 %v639_v40 }
  0xbf   :  { %594 = vmatprep.subr.bf16.mxu1 %v698_v2 }
  0xc2   :  { %595 = vmatpush3.bf16.msra.mxu1 %v640_v41 }
  0xc3   :  { %596 = vmatprep.subr.bf16.mxu1 %v698_v2 }
  0xc6   :  { %597 = vmatpush3.bf16.msra.mxu1 %v641_v42 }
  0xc7   :  { %598 = vmatprep.subr.bf16.mxu1 %v698_v2 }
  0xca   :  { %599 = vmatpush3.bf16.msra.mxu1 %v642_v52 }
  0xcb   :  { %600 = vmatprep.subr.bf16.mxu1 %v698_v2 }
  0xce   :  { %601 = vmatpush3.bf16.msra.mxu1 %v643_v53 }
 0x101   :  { %v144_v32 = vpop.f32.mrb[0].mxu0 }
 0x102   :  { %v544_v33 = vpop.f32.mrb[1].mxu0 }
 0x103   :  { %v147_v34 = vpop.f32.mrb[2].mxu0 }
 0x104   :  { %v545_v36 = vpop.f32.mrb[3].mxu0 }
 0x184   :  { %v232_v43 = vpop.f32.mrb[0].mxu1 }
 0x185   :  { %v233_v45 = vadd.f32 %v232_v43, %v144_v32  ;;  %v564_v46 = vpop.f32.mrb[1].mxu1 }
 0x186   :  { %v235_v47 = vpop.f32.mrb[2].mxu1 }
 0x187   :  { %v245_v48 = vadd.f32 %v492_v44, %v233_v45  ;;  %v565_v49 = vpop.f32.mrb[3].mxu1 }
 0x189   :  { %v246_v50 = vmax.f32 %v245_v48, 0.0 }
 0x18b   :  { %v247_v51 = vpack.c.bf16 %v246_v50, %v246_v50 }
 0x18d   :  { %583 = vmatmul.mubr.bf16.vlgmr.msra.gmra.mrb[4].mxu0 %v247_v51 }
 0x260   :  { %v353_v55 = vpop.f32.mrb[4].mxu0 }
 0x261   :  { %v354_v56 = vadd.f32 %v493_v54, %v353_v55  ;;  %v584_v57 = vpop.f32.mrb[5].mxu0 }
 0x262   :  { %v356_v58 = vpop.f32.mrb[6].mxu0 }
 0x263   :  { %v359_v59 = vmax.f32 %v354_v56, 0.0  ;;  %v585_v60 = vpop.f32.mrb[7].mxu0 }
 0x265   :  { %v360_v61 = vpack.c.bf16 %v359_v59, %v359_v59 }
 0x267   :  { %603 = vmatmul.mubr.bf16.vlgmr.msra.gmra.mrb[4].mxu1 %v360_v61 }
 0x33a   :  { %v466_v63 = vpop.f32.mrb[4].mxu1 }
 0x33b   :  { %v467_v0 = vadd.f32 %v502_v62, %v466_v63  ;;  %v604_v1 = vpop.f32.mrb[5].mxu1 }
 0x33c   :  { %v469_v2 = vpop.f32.mrb[6].mxu1 }
 0x33d   :  { %v472_v3 = vpack.c.bf16 %v467_v0, %v467_v0  ;;  %v605_v4 = vpop.f32.mrb[7].mxu1 }
 0x33f   :  { %473 = vst [vmem:[%s863_s9] sm:$0xf] %v472_v3 }
 0x340   :  { %478 = vsyncpa [#allocation3], 1 }
 0x341   :  { %479 = vsyncpa [#allocation5], 1 }

</bundles_post_ra>
